<compile_context>
chip_gen: v5e
topology: v5e:2x2
jax: 0.10.0
libtpu: 0.0.40
codegen_flags: <defaults>
</compile_context>

<pallas_src>
import functools

import jax
import jax.numpy as jnp
from jax.experimental import pallas as pl
from jax.experimental.pallas import tpu as pltpu

GAMMA = 2  # statically 2 -> lowered as a square, not a float pow

_TARGET_TILE_BYTES = 2 << 20  # aim for ~2 MiB of logits per grid step


def _round_up(x, m):
    return (x + m - 1) // m * m


def _focal_loss_kernel(x_ref, t_ref, a_ref, o_ref, acc_ref, *, n_valid):
    """One grid step handles a (1, C, TL) logits tile of one batch element.

    x_ref:   (1, C, TL)  logits tile (classes on sublanes, spatial on lanes)
    t_ref:   (1, 1, TL)  int32 target tile
    a_ref:   (C, 1)      per-class alpha weights (same tiny block every step)
    o_ref:   (1, 1, 1)   per-batch partial sum (written once, on the last tile)
    acc_ref: (1, 1)      f32 VMEM scratch accumulator
    """
    l = pl.program_id(1)
    n_l = pl.num_programs(1)

    @pl.when(l == 0)
    def _():
        acc_ref[...] = jnp.zeros_like(acc_ref)

    x = x_ref[0].astype(jnp.float32)          # (C, TL)
    tgt = t_ref[0]                            # (1, TL) int32
    tile_l = x.shape[1]

    # Numerically stable log-softmax over the class (sublane) axis.
    m = jnp.max(x, axis=0, keepdims=True)
    z = x - m
    lse = jnp.log(jnp.sum(jnp.exp(z), axis=0, keepdims=True))
    logp = z - lse                            # (C, TL)

    # gather(1, target) and alpha[target] via a one-hot select over C.
    cls = jax.lax.broadcasted_iota(jnp.int32, logp.shape, 0)
    onehot = cls == tgt                       # (C, TL)
    logpt = jnp.sum(jnp.where(onehot, logp, 0.0), axis=0, keepdims=True)   # (1, TL)
    at = jnp.sum(jnp.where(onehot, a_ref[...].astype(jnp.float32), 0.0),
                 axis=0, keepdims=True)                                    # (1, TL)
    pt = jnp.exp(logpt)

    # gamma == 2 -> square (VPU) instead of a float pow (EUP exp/log chain).
    loss = -jnp.square(1.0 - pt) * at * logpt                              # (1, TL)

    # Mask lanes that are padding past the true H*W extent.
    lane = l * tile_l + jax.lax.broadcasted_iota(jnp.int32, loss.shape, 1)
    loss = jnp.where(lane < n_valid, loss, 0.0)

    acc_ref[...] += jnp.sum(loss)

    @pl.when(l == n_l - 1)
    def _():
        o_ref[...] = acc_ref[...].reshape(o_ref.shape)


def focal_loss(logits_nchw, target_nhw, alpha):
    """logits_nchw: (N, C, H, W) float; target_nhw: (N, H, W) int;
    alpha: (C,) float per-class weights.
    Returns scalar float32 mean focal loss (gamma=2, size_average=True)."""
    N, C, H, W = logits_nchw.shape
    L = H * W

    x = logits_nchw.reshape(N, C, L)                     # no transpose / re-layout
    t = target_nhw.reshape(N, 1, L).astype(jnp.int32)
    a = jnp.asarray(alpha, jnp.float32).reshape(C, 1)

    # Lane-dense spatial tile: multiple of 128, sized for ~2 MiB of logits/step.
    bytes_per_col = C * x.dtype.itemsize
    tile_l = max(128, (_TARGET_TILE_BYTES // bytes_per_col) // 128 * 128)
    tile_l = min(tile_l, _round_up(L, 128))
    l_pad = _round_up(L, tile_l)
    if l_pad != L:
        x = jnp.pad(x, ((0, 0), (0, 0), (0, l_pad - L)))
        t = jnp.pad(t, ((0, 0), (0, 0), (0, l_pad - L)))
    num_l = l_pad // tile_l

    kernel = functools.partial(_focal_loss_kernel, n_valid=L)

    cost = pl.CostEstimate(
        flops=10 * N * L * C,
        transcendentals=2 * N * L * C,
        bytes_accessed=x.size * x.dtype.itemsize + t.size * 4 + N * 4,
    )

    partial_sums = pl.pallas_call(
        kernel,
        out_shape=jax.ShapeDtypeStruct((N, 1, 1), jnp.float32),
        grid_spec=pltpu.PrefetchScalarGridSpec(
            num_scalar_prefetch=0,
            grid=(N, num_l),
            in_specs=[
                pl.BlockSpec((1, C, tile_l), lambda n, l: (n, 0, l)),
                pl.BlockSpec((1, 1, tile_l), lambda n, l: (n, 0, l)),
                pl.BlockSpec((C, 1), lambda n, l: (0, 0)),
            ],
            out_specs=pl.BlockSpec((1, 1, 1), lambda n, l: (n, 0, 0)),
            scratch_shapes=[pltpu.VMEM((1, 1), jnp.float32)],
        ),
        compiler_params=pltpu.CompilerParams(
            dimension_semantics=("parallel", "arbitrary"),
            vmem_limit_bytes=48 * 1024 * 1024,
        ),
        cost_estimate=cost,
    )(x, t, a)

    # size_average=True -> mean over all N*H*W rows; tiny final reduction here.
    return jnp.sum(partial_sums) / jnp.float32(N * L)


def focal_loss_ref(logits_nchw, target_nhw, alpha):
    """Pure-JAX reference mirroring the PyTorch forward (gamma=2)."""
    N, C, H, W = logits_nchw.shape
    x = jnp.transpose(logits_nchw.reshape(N, C, H * W), (0, 2, 1)).reshape(-1, C)
    t = target_nhw.reshape(-1).astype(jnp.int32)
    logp = jax.nn.log_softmax(x.astype(jnp.float32), axis=1)
    logpt = jnp.take_along_axis(logp, t[:, None], axis=1)[:, 0]
    pt = jnp.exp(logpt)
    at = jnp.asarray(alpha, jnp.float32)[t]
    logpt = logpt * at
    loss = -1.0 * (1.0 - pt) ** 2 * logpt
    return jnp.mean(loss)


if __name__ == "__main__":
    key = jax.random.PRNGKey(0)
    k1, k2 = jax.random.split(key)

    N, C, H, W = 2, 4, 16, 16
    logits = jax.random.normal(k1, (N, C, H, W), dtype=jnp.float32)
    target = jax.random.randint(k2, (N, H, W), 0, C, dtype=jnp.int32)
    # Deterministic per-class alpha (the module accepts a list alpha).
    alpha = jnp.array([0.1, 0.2, 0.3, 0.4], dtype=jnp.float32)

    out = focal_loss(logits, target, alpha)
    out = jax.block_until_ready(out)

    ref = focal_loss_ref(logits, target, alpha)
    assert jnp.allclose(out, ref, rtol=1e-5, atol=1e-5), (out, ref)

    print("KERNEL_OK")
</pallas_src>

<mosaic_0001>
module attributes {stable_mosaic.version = 11 : i64} {
  func.func @_focal_loss_kernel(%arg0: i32, %arg1: i32, %arg2: memref<1x4x256xf32, #tpu.memory_space<vmem>>, %arg3: memref<1x1x256xi32, #tpu.memory_space<vmem>>, %arg4: memref<4x1xf32, #tpu.memory_space<vmem>>, %arg5: memref<1x1x1xf32, #tpu.memory_space<vmem>>, %arg6: memref<1x1xf32, #tpu.memory_space<vmem>>) attributes {dimension_semantics = [#tpu.dimension_semantics<parallel>, #tpu.dimension_semantics<arbitrary>], iteration_bounds = array<i64: 2, 1>, scalar_prefetch = 0 : i64, scratch_operands = 1 : i64, tpu.core_type = #tpu.core_type<tc>, window_params = [{transform_indices = @transform_0, window_bounds = array<i64: 1, 4, 256>}, {transform_indices = @transform_1, window_bounds = array<i64: 1, 1, 256>}, {pipeline_mode = #tpu.pipeline_mode<synchronous>, transform_indices = @transform_2, window_bounds = array<i64: 4, 1>}, {transform_indices = @transform_3, window_bounds = array<i64: 1, 1, 1>}]} {
    %c0_i32 = arith.constant 0 : i32
    %0 = arith.cmpi eq, %arg1, %c0_i32 : i32
    %1 = arith.extui %0 : i1 to i32
    %c0_i32_0 = arith.constant 0 : i32
    %2 = arith.cmpi ne, %1, %c0_i32_0 : i32
    scf.if %2 {
      %cst_24 = arith.constant 0.000000e+00 : f32
      %58 = vector.broadcast %cst_24 : f32 to vector<1x1xf32>
      %c0_25 = arith.constant 0 : index
      %c0_26 = arith.constant 0 : index
      %59 = vector.load %arg6[%c0_25, %c0_26] : memref<1x1xf32, #tpu.memory_space<vmem>>, vector<1x1xf32>
      tpu.vector_store %arg6[%c0_25, %c0_26], %58 {strides = array<i32>} : memref<1x1xf32, #tpu.memory_space<vmem>>, vector<1x1xf32>,
    } else {
    }
    %c0 = arith.constant 0 : index
    %c0_1 = arith.constant 0 : index
    %c0_2 = arith.constant 0 : index
    %3 = vector.load %arg2[%c0, %c0_1, %c0_2] : memref<1x4x256xf32, #tpu.memory_space<vmem>>, vector<1x4x256xf32>
    %4 = vector.shape_cast %3 : vector<1x4x256xf32> to vector<4x256xf32>
    %c0_3 = arith.constant 0 : index
    %c0_4 = arith.constant 0 : index
    %c0_5 = arith.constant 0 : index
    %5 = vector.load %arg3[%c0_3, %c0_4, %c0_5] : memref<1x1x256xi32, #tpu.memory_space<vmem>>, vector<1x1x256xi32>
    %6 = vector.shape_cast %5 : vector<1x1x256xi32> to vector<1x256xi32>
    %cst = arith.constant dense<0xFF800000> : vector<256xf32>
    %7 = vector.multi_reduction <maximumf>, %4, %cst [0] : vector<4x256xf32> to vector<256xf32>
    %8 = vector.shape_cast %7 : vector<256xf32> to vector<1x256xf32>
    %9 = vector.broadcast %8 : vector<1x256xf32> to vector<4x256xf32>
    %10 = arith.subf %4, %9 : vector<4x256xf32>
    %11 = math.exp %10 : vector<4x256xf32>
    %cst_6 = arith.constant dense<0.000000e+00> : vector<256xf32>
    %12 = vector.multi_reduction <add>, %11, %cst_6 [0] : vector<4x256xf32> to vector<256xf32>
    %13 = vector.shape_cast %12 : vector<256xf32> to vector<1x256xf32>
    %14 = math.log %13 : vector<1x256xf32>
    %15 = vector.broadcast %14 : vector<1x256xf32> to vector<4x256xf32>
    %16 = arith.subf %10, %15 : vector<4x256xf32>
    %17 = tpu.iota {dimensions = array<i32: 0>} : vector<4x256xi32>
    %18 = vector.broadcast %6 : vector<1x256xi32> to vector<4x256xi32>
    %19 = arith.cmpi eq, %17, %18 : vector<4x256xi32>
    %cst_7 = arith.constant 0.000000e+00 : f32
    %20 = vector.broadcast %cst_7 : f32 to vector<4x256xf32>
    %21 = arith.select %19, %16, %20 : vector<4x256xi1>, vector<4x256xf32>
    %cst_8 = arith.constant dense<0.000000e+00> : vector<256xf32>
    %22 = vector.multi_reduction <add>, %21, %cst_8 [0] : vector<4x256xf32> to vector<256xf32>
    %23 = vector.shape_cast %22 : vector<256xf32> to vector<1x256xf32>
    %c0_9 = arith.constant 0 : index
    %c0_10 = arith.constant 0 : index
    %24 = vector.load %arg4[%c0_9, %c0_10] : memref<4x1xf32, #tpu.memory_space<vmem>>, vector<4x1xf32>
    %cst_11 = arith.constant 0.000000e+00 : f32
    %25 = vector.shape_cast %24 : vector<4x1xf32> to vector<4x1xf32>
    %26 = vector.broadcast %25 : vector<4x1xf32> to vector<4x256xf32>
    %27 = vector.broadcast %cst_11 : f32 to vector<4x256xf32>
    %28 = arith.select %19, %26, %27 : vector<4x256xi1>, vector<4x256xf32>
    %cst_12 = arith.constant dense<0.000000e+00> : vector<256xf32>
    %29 = vector.multi_reduction <add>, %28, %cst_12 [0] : vector<4x256xf32> to vector<256xf32>
    %30 = vector.shape_cast %29 : vector<256xf32> to vector<1x256xf32>
    %31 = math.exp %23 : vector<1x256xf32>
    %cst_13 = arith.constant 1.000000e+00 : f32
    %32 = vector.broadcast %cst_13 : f32 to vector<1x256xf32>
    %33 = arith.subf %32, %31 : vector<1x256xf32>
    %34 = arith.mulf %33, %33 : vector<1x256xf32>
    %cst_14 = arith.constant 0.000000e+00 : f32
    %35 = vector.broadcast %cst_14 : f32 to vector<1x256xf32>
    %36 = arith.subf %35, %34 : vector<1x256xf32>
    %37 = arith.mulf %36, %30 : vector<1x256xf32>
    %38 = arith.mulf %37, %23 : vector<1x256xf32>
    %c256_i32 = arith.constant 256 : i32
    %39 = arith.muli %arg1, %c256_i32 : i32
    %40 = tpu.iota {dimensions = array<i32: 1>} : vector<1x256xi32>
    %41 = vector.broadcast %39 : i32 to vector<1x256xi32>
    %42 = arith.addi %41, %40 : vector<1x256xi32>
    %c256_i32_15 = arith.constant 256 : i32
    %43 = vector.broadcast %c256_i32_15 : i32 to vector<1x256xi32>
    %44 = arith.cmpi slt, %42, %43 : vector<1x256xi32>
    %cst_16 = arith.constant 0.000000e+00 : f32
    %45 = vector.broadcast %cst_16 : f32 to vector<1x256xf32>
    %46 = arith.select %44, %38, %45 : vector<1x256xi1>, vector<1x256xf32>
    %c0_17 = arith.constant 0 : index
    %c0_18 = arith.constant 0 : index
    %47 = vector.load %arg6[%c0_17, %c0_18] : memref<1x1xf32, #tpu.memory_space<vmem>>, vector<1x1xf32>
    %48 = vector.shape_cast %46 : vector<1x256xf32> to vector<1x1x256xf32>
    %cst_19 = arith.constant dense<0.000000e+00> : vector<1xf32>
    %49 = vector.multi_reduction <add>, %48, %cst_19 [1, 2] : vector<1x1x256xf32> to vector<1xf32>
    %50 = vector.shape_cast %49 : vector<1xf32> to vector<1x1x1xf32>
    %51 = vector.extract %50[0, 0, 0] : f32 from vector<1x1x1xf32>
    %52 = vector.broadcast %51 : f32 to vector<1x1xf32>
    %53 = arith.addf %47, %52 : vector<1x1xf32>
    %c0_20 = arith.constant 0 : index
    %c0_21 = arith.constant 0 : index
    %54 = vector.load %arg6[%c0_20, %c0_21] : memref<1x1xf32, #tpu.memory_space<vmem>>, vector<1x1xf32>
    tpu.vector_store %arg6[%c0_20, %c0_21], %53 {strides = array<i32>} : memref<1x1xf32, #tpu.memory_space<vmem>>, vector<1x1xf32>,
    %c0_i32_22 = arith.constant 0 : i32
    %55 = arith.cmpi eq, %arg1, %c0_i32_22 : i32
    %56 = arith.extui %55 : i1 to i32
    %c0_i32_23 = arith.constant 0 : i32
    %57 = arith.cmpi ne, %56, %c0_i32_23 : i32
    scf.if %57 {
      %c0_24 = arith.constant 0 : index
      %c0_25 = arith.constant 0 : index
      %58 = vector.load %arg6[%c0_24, %c0_25] : memref<1x1xf32, #tpu.memory_space<vmem>>, vector<1x1xf32>
      %59 = vector.shape_cast %58 : vector<1x1xf32> to vector<1x1x1xf32>
      %c0_26 = arith.constant 0 : index
      %c0_27 = arith.constant 0 : index
      %c0_28 = arith.constant 0 : index
      %60 = vector.load %arg5[%c0_26, %c0_27, %c0_28] : memref<1x1x1xf32, #tpu.memory_space<vmem>>, vector<1x1x1xf32>
      tpu.vector_store %arg5[%c0_26, %c0_27, %c0_28], %59 {strides = array<i32>} : memref<1x1x1xf32, #tpu.memory_space<vmem>>, vector<1x1x1xf32>,
    } else {
    }
    return
  }
  func.func @transform_0(%arg0: i32, %arg1: i32) -> (i32, i32, i32) {
    %c0_i32 = arith.constant 0 : i32
    %c0_i32_0 = arith.constant 0 : i32
    return %arg0, %c0_i32, %arg1 : i32, i32, i32
  }
  func.func @transform_1(%arg0: i32, %arg1: i32) -> (i32, i32, i32) {
    %c0_i32 = arith.constant 0 : i32
    %c0_i32_0 = arith.constant 0 : i32
    return %arg0, %c0_i32, %arg1 : i32, i32, i32
  }
  func.func @transform_2(%arg0: i32, %arg1: i32) -> (i32, i32) {
    %c0_i32 = arith.constant 0 : i32
    %c0_i32_0 = arith.constant 0 : i32
    %c0_i32_1 = arith.constant 0 : i32
    return %c0_i32, %c0_i32_0 : i32, i32
  }
  func.func @transform_3(%arg0: i32, %arg1: i32) -> (i32, i32, i32) {
    %c0_i32 = arith.constant 0 : i32
    %c0_i32_0 = arith.constant 0 : i32
    %c0_i32_1 = arith.constant 0 : i32
    return %arg0, %c0_i32, %c0_i32_0 : i32, i32, i32
  }
}

</mosaic_0001>

<bundles_post_ra>
// kernel: tpu_custom_call.1
= control target key start
LH: loop header
LB: loop body
LE: loop exit
PB: predicated region body
PF: predicated region fallthrough
CT: control target
= control target key end

     0   :  { %8 = vsyncpa [#allocation4], 0  ;;  %s801_s0 = inlined_call_operand.hbm [shape: f32[2,4,256], index: 0, kind: input, shape index: {}]   ;;  %s802_s1 = inlined_call_operand.vmem [shape: s32[2,1,256], index: 1, kind: input, shape index: {}]   ;;  %s803_s2 = inlined_call_operand.vmem [shape: f32[4,1], index: 2, kind: input, shape index: {}]   ;;  %s804_s3 = inlined_call_operand.vmem [shape: f32[2,1,1], index: 3, kind: output, shape index: {}]  }
   0x1   :  { %10 = vsyncpa [#allocation4 + $0x1], 0  ;;  %s674_s12 = smov 0   ;;  %s676_s13 = smov 0  }
   0x2   :  { %s678_s14 = smov 0   ;;  %s680_s15 = smov 0  }
   0x3   :  { %s682_s16 = smov 0   ;;  %s684_s17 = smov 0  }
   0x4 LB: > { %s487_s18 = sadd.s32 4294967295, %s650_s17   ;;  %s28_s19 = sadd.s32 1, %s646_s16  ;;  %s650_s17 = sphi %s684_s17, %s16_s17   ;;  %s646_s16 = sphi %s682_s16, %s815_s16   ;;  %s642_s15 = sphi %s680_s15, %s814_s15   ;;  %s638_s14 = sphi %s678_s14, %s813_s14   ;;  %s634_s13 = sphi %s676_s13, %s812_s13   ;;  %s630_s12 = sphi %s674_s12, %s811_s12  }
   0x5   : > { %p30_p0 = scmp.ge.s32.totalorder %s28_s19, 2  ;;  %s37_s20 = sadd.s32 1, %s638_s14 }
   0x6   : > { %p44_p1 = scmp.ne.s32.totalorder %s638_s14, %s634_s13  ;;  %p45_p2 = scmp.eq.s32.totalorder %s650_s17, 0 }
   0x7   : > { %s817_s19 = smov (%p30_p0, %s28_s19), 0  ;;  %p50_p4 = scmp.ne.s32.totalorder %s634_s13, %s630_s12 }
   0x8   : > { %p710_p3 = por %p45_p2, %p44_p1  ;;  %s32_s22 = ssub.s32 %s646_s16, %s817_s19 }
   0x9   : > { %p51_p5 = scmp.eq.s32.totalorder %s487_s18, 0  ;;  %p35_p6 = scmp.eq.s32.totalorder %s32_s22, 0 }
   0xa   : > { %p508_p8 = scmp.lt.s32.totalorder %s650_s17, 2  ;;  %s152_s25 = sand.u32 1, %s638_s14  }
   0xb   : > { %p717_p7 = por %p51_p5, %p50_p4  ;;  %s499_s26 = sshll.u32 %s646_s16, 3 }
   0xc   : > { %s723_s24 = scalar_select %p35_p6, %s638_s14, %s37_s20  }
   0xd   : > { %s491_s27 = sshll.u32 %s152_s25, 3  ;;  %s163_s30 = scalar_lea.hbm %s801_s0, %s499_s26 }
   0xe   : > { %s165_s4 = sshll.u32 %s163_s30, 4  ;;  %s156_s5 = scalar_lea.vmem [#allocation3], %s491_s27  ;;  %s166_s4 = int_to_ptr.hbm [resolvable:$true] %s165_s4 }
   0xf   : > { %s167_s6 = sshll.u32 %s156_s5, 4  ;;  %p505_p9 = pnand %p508_p8, %p710_p3  ;;  %s168_s6 = int_to_ptr.vmem [resolvable:$true] %s167_s6 }
  0x10   : > { %p494_p10 = scmp.ge.s32.totalorder %s650_s17, 1  ;;  %p184_p11 = scmp.lt.s32.totalorder %s650_s17, 3 }
  0x11   : > { %s153_s7 = scalar_lea.sflag [#allocation4], %s152_s25 }
  0x12   : > { %507 = dma.hbm_to_vmem [thread:$0]  (!%p505_p9), %s166_s4, 128, %s168_s6, %s153_s7  }
  0x13   : > { %p185_p12 = pnand %p494_p10, %p184_p11 }
  0x14   : > { %s190_s8 = sand.u32 (!%p185_p12), 1, %s634_s13  }
  0x15   : > { %188 = sbr.rel (%p185_p12) target bundleno = 355 (0x163), region = 32  ;;  %s495_s9 = sshll.u32 (!%p185_p12), %s190_s8, 3 }
  0x16   : > { %s191_s10 = scalar_lea.sflag (!%p185_p12), [#allocation4], %s190_s8  ;;  %s194_s11 = scalar_lea.vmem (!%p185_p12), [#allocation3], %s495_s9 }
  0x1a   : > { %625 = dma.done.wait (%p717_p7), %s191_s10, 128  }
  0x1b   : > { %627 = vsyncadd (%p717_p7), %s191_s10, 4294967168  ;;  %v652_v0 = vmov 0   ;;  %v332_v1 = vld [vmem:[%s803_s2] sm:$0xf]  ;;  %v243_v2 = vld [vmem:[%s194_s11] sm:$0xff]  ;;  %vm251_vm0 = vcmask 1043456   ;;  %v304_v45 = vlaneseq }
  0x1c   : > { %559 = vset.pattern.permute.xlu0 %v652_v0  ;;  %246 = vst [vmem:[#allocation1] ss:$2 sm:$0xff] %v243_v2  ;;  %p226_p13 = scmp.lt.s32.totalorder %s642_s15, 1  ;;  %vm380_vm3 = vcmask 1040384   ;;  %vm241_vm4 = vcmask 0  }
  0x1d   : > { %335 = vperm.xlu0 %559, %v332_v1   ;;  %v305_v49 = vshrl.u32 %v304_v45, 7 }
  0x1e   : > { %s819_s15 = smov (!%p226_p13, %s642_s15), 1 }
  0x1f   : > { %s496_s20 = sshll.u32 %s819_s15, 1  ;;  %s236_s28 = scalar_lea.vmem %s804_s3, %s819_s15 }
  0x20   : > { %s232_s23 = scalar_lea.vmem %s802_s1, %s496_s20 }
  0x21   : > { %v244_v47 = vld [vmem:[%s232_s23] sm:$0x3] }
  0x22   : > { %v306_v50 = vperm.slane %v244_v47, 0  ;;  %v307_v51 = vperm.slane %v244_v47, 1 }
  0x23   : > { %v247_v3 = vld.sshfl [vmem:[#allocation1] sm:$0xff pattern:$0x75316420]  ;;  %v248_v4 = vld.sshfl [vmem:[#allocation1 + $0x8] sm:$0xff pattern:$0x75316420] }
  0x24   : > { %v252_v5 = vsel %vm251_vm0, %v247_v3, -inf  ;;  %v259_v6 = vsel %vm251_vm0, %v248_v4, -inf  ;;  %vm756_vm1 = vcmp.eq.s32.totalorder %v305_v49, %v306_v50  ;;  %vm760_vm2 = vcmp.eq.s32.totalorder %v305_v49, %v307_v51 }
  0x25   : > { %v253_v7 = vrot.slane %v252_v5, 4  ;;  %v260_v8 = vrot.slane %v259_v6, 4 }
  0x27   : > { %v254_v9 = vmax.f32 %v252_v5, %v253_v7  ;;  %v261_v10 = vmax.f32 %v259_v6, %v260_v8 }
  0x29   : > { %v255_v11 = vrot.slane %v254_v9, 2  ;;  %v262_v12 = vrot.slane %v261_v10, 2 }
  0x2b   : > { %v256_v13 = vmax.f32 %v254_v9, %v255_v11  ;;  %v263_v14 = vmax.f32 %v261_v10, %v262_v12 }
  0x2d   : > { %v257_v15 = vrot.slane %v256_v13, 1  ;;  %v264_v16 = vrot.slane %v263_v14, 1 }
  0x2f   : > { %v258_v17 = vmax.f32 %v256_v13, %v257_v15  ;;  %v265_v18 = vmax.f32 %v263_v14, %v264_v16 }
  0x31   : > { %v268_v19 = vrot.slane %v265_v18, 4 }
  0x33   : > { %v269_v20 = vsel %vm251_vm0, %v258_v17, %v268_v19 }
  0x34   : > { %v271_v21 = vsub.f32 %v243_v2, %v269_v20 }
  0x36   : > { %v272_v22 = vmul.f32 1.442695, %v271_v21 }
  0x38   : > { %560 = vpow2.f32 %v272_v22 }
  0x3e   : > { %v561_v23 = vpop.eup %560 }
  0x3f   : > { %275 = vst [vmem:[#allocation1] ss:$2 sm:$0xff] %v561_v23 }
  0x46   : > { %v276_v24 = vld.sshfl [vmem:[#allocation1] sm:$0xff pattern:$0x75316420]  ;;  %v277_v25 = vld.sshfl [vmem:[#allocation1 + $0x8] sm:$0xff pattern:$0x75316420] }
  0x47   : > { %v280_v26 = vsel %vm251_vm0, %v276_v24, 0.0  ;;  %v287_v27 = vsel %vm251_vm0, %v277_v25, 0.0 }
  0x48   : > { %v281_v28 = vrot.slane %v280_v26, 4  ;;  %v288_v29 = vrot.slane %v287_v27, 4 }
  0x4a   : > { %v282_v30 = vadd.f32 %v281_v28, %v280_v26  ;;  %v289_v31 = vadd.f32 %v288_v29, %v287_v27 }
  0x4c   : > { %v283_v32 = vrot.slane %v282_v30, 2  ;;  %v290_v33 = vrot.slane %v289_v31, 2 }
  0x4e   : > { %v284_v34 = vadd.f32 %v283_v32, %v282_v30  ;;  %v291_v35 = vadd.f32 %v290_v33, %v289_v31 }
  0x50   : > { %v285_v36 = vrot.slane %v284_v34, 1  ;;  %v292_v37 = vrot.slane %v291_v35, 1 }
  0x52   : > { %v286_v38 = vadd.f32 %v285_v36, %v284_v34  ;;  %v293_v39 = vadd.f32 %v292_v37, %v291_v35 }
  0x54   : > { %562 = vlog2.f32 %v286_v38 }
  0x55   : > { %564 = vlog2.f32 %v293_v39 }
  0x5a   : > { %v563_v40 = vpop.eup %562 }
  0x5b   : > { %v565_v41 = vpop.eup %564  ;;  %v295_v42 = vmul.f32 0.6931472, %v563_v40 }
  0x5c   : > { %v297_v43 = vmul.f32 0.6931472, %v565_v41 }
  0x5e   : > { %v300_v44 = vrot.slane %v297_v43, 4 }
  0x60   : > { %v301_v46 = vsel %vm251_vm0, %v295_v42, %v300_v44  ;;  %v653_v42 = vmov 0.0  }
  0x61   : > { %v303_v48 = vsub.f32 %v271_v21, %v301_v46  ;;  %242 = vst.msk [vmem:[#allocation2] sm:$0x1] %vm241_vm4, %v653_v42 }
  0x63   : > { %311 = vst [vmem:[#allocation1] ss:$2 sm:$0xff] %v303_v48 }
  0x68   : > { %v379_v50 = vld [vmem:[#allocation2] sm:$0x1] }
  0x6a   : > { %v312_v54 = vld.sshfl [vmem:[#allocation1] sm:$0xff pattern:$0x75316420]  ;;  %v313_v55 = vld.sshfl [vmem:[#allocation1 + $0x8] sm:$0xff pattern:$0x75316420] }
  0x6b   : > { %v316_v56 = vsel %vm756_vm1, %v312_v54, 0.0  ;;  %v317_v57 = vsel %vm760_vm2, %v313_v55, 0.0 }
  0x6c   : > { %v318_v58 = vsel %vm251_vm0, %v316_v56, 0.0  ;;  %v325_v59 = vsel %vm251_vm0, %v317_v57, 0.0 }
  0x6d   : > { %v319_v60 = vrot.slane %v318_v58, 4  ;;  %v326_v61 = vrot.slane %v325_v59, 4 }
  0x6f   : > { %v320_v62 = vadd.f32 %v319_v60, %v318_v58  ;;  %v327_v63 = vadd.f32 %v326_v61, %v325_v59 }
  0x71   : > { %v321_v0 = vrot.slane %v320_v62, 2  ;;  %v328_v1 = vrot.slane %v327_v63, 2 }
  0x73   : > { %v322_v2 = vadd.f32 %v321_v0, %v320_v62  ;;  %v329_v3 = vadd.f32 %v328_v1, %v327_v63 }
  0x75   : > { %v323_v4 = vrot.slane %v322_v2, 1  ;;  %v330_v5 = vrot.slane %v329_v3, 1 }
  0x77   : > { %v324_v6 = vadd.f32 %v323_v4, %v322_v2  ;;  %v331_v7 = vadd.f32 %v330_v5, %v329_v3 }
  0x79   : > { %v354_v8 = vmul.f32 1.442695, %v324_v6  ;;  %v356_v9 = vmul.f32 1.442695, %v331_v7 }
  0x7b   : > { %566 = vpow2.f32 %v354_v8 }
  0x7c   : > { %568 = vpow2.f32 %v356_v9 }
  0x81   : > { %v567_v10 = vpop.eup %566 }
  0x82   : > { %v569_v11 = vpop.eup %568  ;;  %v358_v19 = vsub.f32 1.0, %v567_v10 }
  0x83   : > { %v359_v20 = vsub.f32 1.0, %v569_v11 }
  0x84   : > { %v360_v25 = vmul.f32 %v358_v19, %v358_v19 }
  0x85   : > { %v361_v26 = vmul.f32 %v359_v20, %v359_v20 }
  0x86   : > { %v362_v31 = vsub.f32 0.0, %v360_v25 }
  0x87   : > { %v363_v32 = vsub.f32 0.0, %v361_v26 }
  0x8f   : > { %v336_v12 = vpop.permute.xlu0 %335 }
  0x90   : > { %v338_v13 = vsel %vm756_vm1, %v336_v12, 0.0  ;;  %v339_v14 = vsel %vm760_vm2, %v336_v12, 0.0 }
  0x91   : > { %v340_v15 = vsel %vm251_vm0, %v338_v13, 0.0  ;;  %v347_v16 = vsel %vm251_vm0, %v339_v14, 0.0 }
  0x92   : > { %v341_v17 = vrot.slane %v340_v15, 4  ;;  %v348_v18 = vrot.slane %v347_v16, 4 }
  0x94   : > { %v342_v21 = vadd.f32 %v341_v17, %v340_v15  ;;  %v349_v22 = vadd.f32 %v348_v18, %v347_v16 }
  0x96   : > { %v343_v23 = vrot.slane %v342_v21, 2  ;;  %v350_v24 = vrot.slane %v349_v22, 2 }
  0x98   : > { %v344_v27 = vadd.f32 %v343_v23, %v342_v21  ;;  %v351_v28 = vadd.f32 %v350_v24, %v349_v22 }
  0x9a   : > { %v345_v29 = vrot.slane %v344_v27, 1  ;;  %v352_v30 = vrot.slane %v351_v28, 1 }
  0x9c   : > { %v346_v33 = vadd.f32 %v345_v29, %v344_v27  ;;  %v353_v34 = vadd.f32 %v352_v30, %v351_v28 }
  0x9e   : > { %v364_v35 = vmul.f32 %v362_v31, %v346_v33  ;;  %v365_v36 = vmul.f32 %v363_v32, %v353_v34 }
  0xa0   : > { %v366_v37 = vmul.f32 %v364_v35, %v324_v6  ;;  %v367_v38 = vmul.f32 %v365_v36, %v331_v7 }
  0xa2   : > { %v381_v39 = vsel %vm380_vm3, %v366_v37, 0.0  ;;  %v382_v40 = vsel %vm380_vm3, %v367_v38, 0.0 }
  0xa3   : > { %v383_v41 = vadd.f32 %v382_v40, %v381_v39 }
  0xa5   : > { %384 = vadd.xlane.f32.xlu0 %v383_v41 }
 0x118   : > { %v385_v43 = vpop.xlane.xlu0 %384 }
 0x119   : > { %v386_v44 = vrot.slane %v385_v43, 4 }
 0x11b   : > { %v387_v45 = vadd.f32 %v386_v44, %v385_v43 }
 0x11d   : > { %v388_v46 = vrot.slane %v387_v45, 2 }
 0x11f   : > { %v389_v47 = vadd.f32 %v388_v46, %v387_v45 }
 0x121   : > { %v390_v48 = vrot.slane %v389_v47, 1 }
 0x123   : > { %v391_v49 = vadd.f32 %v390_v48, %v389_v47 }
 0x125   : > { %500 = vpush %v391_v49 }
 0x156   : > { %s501_s25 = spop %500 }
 0x157   : > { %v393_v51 = vstv %s501_s25 }
 0x158   : > { %v394_v52 = vadd.f32 %v393_v51, %v379_v50 }
 0x15a   : > { %396 = vst.msk [vmem:[#allocation2] sm:$0x1] %vm241_vm4, %v394_v52 }
 0x161   : > { %v400_v53 = vld [vmem:[#allocation2] sm:$0x1] }
 0x162   : > { %401 = vst.msk [vmem:[%s236_s28] sm:$0x1] %vm241_vm4, %v400_v53 }
 0x163 PF: > { %s16_s17 = sadd.s32 1, %s650_s17   ;;  %s811_s12 = smov %s634_s13 }
 0x164   : > { %p13_p0 = scmp.ge.s32.totalorder %s16_s17, 4   ;;  %s812_s13 = smov %s638_s14 }
 0x165   : > { %s813_s14 = smov %s723_s24  ;;  %s814_s15 = smov %s646_s16 }
 0x166   : > { %s815_s16 = smov %s817_s19  ;;  %15 = sbr.rel (!%p13_p0) target bundleno = 4 (0x4), region = 83 }
 0x16b   :  { %419 = vsyncpa [#allocation4], 1 }
 0x16c   :  { %421 = vsyncpa [#allocation4 + $0x1], 1 }

</bundles_post_ra>
